<compile_context>
chip_gen: v5e
topology: v5e:2x2
jax: 0.10.0
libtpu: 0.0.40
codegen_flags: <defaults>
</compile_context>

<pallas_src>
import functools

import jax
import jax.numpy as jnp
from jax.experimental import pallas as pl
from jax.experimental.pallas import tpu as pltpu

LANE = 128        # lane width (last dim of every block)
NEG_BIG = -1.0e4  # logit whose sigmoid / BCE contribution is exactly 0 in f32


def _round_up(a, b):
    return ((a + b - 1) // b) * b


def _sublane_multiple(dtype):
    """Required sublane multiple for a block of this dtype (8/16/32 for 4/2/1B)."""
    return max(8, 32 // jnp.dtype(dtype).itemsize)


def _tpu_config():
    """Per-generation (num_parallel_cores, max_block_rows)."""
    kind = ""
    try:
        kind = jax.devices()[0].device_kind.lower()
    except Exception:
        pass
    single_core = any(s in kind for s in
                      ("v5e", "v5 lite", "v5lite", "v6e", "v6 lite", "v6lite"))
    ncores = 1 if single_core else 2   # dual-TC / megacore chips get 2
    # Block-size cap: 8192 rows (4 MiB f32/input) fits v6e/v7x default scoped
    # VMEM (32 MiB) double-buffered; everything else (incl. v5e's 16 MiB
    # default) gets the portable 4096-row (2 MiB) blocks.
    if any(s in kind for s in ("v6", "v7", "7x")):
        max_rows = 8192
    else:
        max_rows = 4096
    return ncores, max_rows


def _accumulate(x, t, out_ref, valid_rows):
    """Add this block's lane-wise partial sums into the (8, LANE) accumulator."""
    if valid_rows is not None:
        # Row-level mask for ragged / phantom blocks. Masked logits -> NEG_BIG,
        # masked targets -> 0, so masked elements contribute exactly 0 to all
        # four partial sums (exp(-|NEG_BIG|) underflows to 0 in f32).
        row_ids = jax.lax.broadcasted_iota(jnp.int32, x.shape, 0)
        mask = row_ids < valid_rows
        x = jnp.where(mask, x, NEG_BIG)
        t = jnp.where(mask, t, 0.0)

    # Shared exp(-|x|) for both the stable sigmoid and stable BCE-with-logits.
    e = jnp.exp(-jnp.abs(x))
    inv = pl.reciprocal(1.0 + e)                 # exact; approx=True only if tol allows
    p = jnp.where(x >= 0, 1.0, e) * inv          # sigmoid(x), numerically stable
    # max(x,0) - x*t + log1p(exp(-|x|))  ==  -(t*log(p) + (1-t)*log(1-p))
    bce = jnp.maximum(x, 0.0) - x * t + jnp.log1p(e)

    # Direct row accumulations (no concatenate -> no per-step layout shuffle).
    out_ref[0:1, :] += jnp.sum(p * t, axis=0, keepdims=True)   # intersection
    out_ref[1:2, :] += jnp.sum(p, axis=0, keepdims=True)       # sum(p)
    out_ref[2:3, :] += jnp.sum(t, axis=0, keepdims=True)       # sum(t)
    out_ref[3:4, :] += jnp.sum(bce, axis=0, keepdims=True)     # sum(bce)


def _dice_bce_kernel(x_ref, t_ref, out_ref, *, blocks_per_core, n_rows, need_mask):
    c = pl.program_id(0)   # "parallel" (core) axis
    i = pl.program_id(1)   # sequential reduction axis

    @pl.when(i == 0)
    def _():
        out_ref[...] = jnp.zeros_like(out_ref)

    x = x_ref[...].astype(jnp.float32)
    t = t_ref[...].astype(jnp.float32)
    rows = x.shape[0]

    if need_mask:
        gb = c * blocks_per_core + i        # global (unclamped) block index
        valid = n_rows - gb * rows          # rows of this block that are real

        @pl.when(valid >= rows)             # full block: no per-element mask
        def _():
            _accumulate(x, t, out_ref, None)

        @pl.when(valid < rows)              # ragged / phantom block (rare)
        def _():
            _accumulate(x, t, out_ref, valid)
    else:
        _accumulate(x, t, out_ref, None)


def dice_bce_loss(inputs, targets, smooth=1.0):
    """inputs: logits of any shape (e.g. NCHW); targets: same shape, in [0,1]."""
    n = inputs.size
    x = inputs.reshape(-1)
    t = targets.reshape(-1)

    # Keep native float dtypes (bf16 targets halve their HBM stream); only cast
    # non-float inputs.  {0,1} targets are exact in bfloat16.
    if not jnp.issubdtype(x.dtype, jnp.floating):
        x = x.astype(jnp.float32)
    if not jnp.issubdtype(t.dtype, jnp.floating):
        t = t.astype(jnp.bfloat16)

    # Pad (only if n % 128 != 0) so the flat array can be viewed as
    # (n_rows, LANE).  Padded logits are NEG_BIG / padded targets 0, so they
    # contribute exactly 0 to every partial sum.
    # TODO(synk): mask the ragged tail in-kernel (global element index < n) to
    # avoid this full-copy pad for lane-unaligned shapes.
    rem = n % LANE
    if rem:
        pad = LANE - rem
        x = jnp.pad(x, (0, pad), constant_values=NEG_BIG)
        t = jnp.pad(t, (0, pad), constant_values=0)
    n_rows = x.size // LANE
    x2 = x.reshape(n_rows, LANE)
    t2 = t.reshape(n_rows, LANE)

    ncores, max_rows = _tpu_config()
    sub = max(_sublane_multiple(x2.dtype), _sublane_multiple(t2.dtype))
    block_rows = min(max_rows, _round_up(n_rows, sub))
    total_blocks = pl.cdiv(n_rows, block_rows)
    ncores = min(ncores, total_blocks)          # never more cores than blocks
    blocks_per_core = pl.cdiv(total_blocks, ncores)
    max_block = total_blocks - 1
    # Masking is only required if the last real block is ragged or some
    # (core, step) pairs map past the end of the array.
    need_mask = (n_rows % block_rows != 0) or (blocks_per_core * ncores != total_blocks)

    def in_map(c, i):
        # Clamp so phantom blocks (past the end) re-read the last real block;
        # their contribution is zeroed by the in-kernel row mask.
        return (jnp.minimum(c * blocks_per_core + i, max_block), 0)

    kernel = functools.partial(
        _dice_bce_kernel,
        blocks_per_core=blocks_per_core,
        n_rows=n_rows,
        need_mask=need_mask,
    )

    bytes_in = (x2.size * x2.dtype.itemsize + t2.size * t2.dtype.itemsize)
    cost = pl.CostEstimate(
        flops=12 * n,
        transcendentals=2 * n,                       # exp + log1p per element
        bytes_accessed=bytes_in + ncores * 8 * LANE * 4,
    )

    partials = pl.pallas_call(
        kernel,
        out_shape=jax.ShapeDtypeStruct((ncores, 8, LANE), jnp.float32),
        grid=(ncores, blocks_per_core),
        in_specs=[
            pl.BlockSpec((block_rows, LANE), in_map),
            pl.BlockSpec((block_rows, LANE), in_map),
        ],
        out_specs=pl.BlockSpec((None, 8, LANE), lambda c, i: (c, 0, 0)),
        compiler_params=pltpu.CompilerParams(
            dimension_semantics=("parallel", "arbitrary")),
        cost_estimate=cost,
    )(x2, t2)

    # Tiny epilogue: cross-core + cross-lane combine and scalar loss math.
    sums = jnp.sum(partials, axis=(0, 2))                 # (8,), rows 4..7 are 0
    inter, sum_p, sum_t, sum_bce = sums[0], sums[1], sums[2], sums[3]
    dice_loss = 1.0 - (2.0 * inter + smooth) / (sum_p + sum_t + smooth)
    bce_mean = sum_bce / n
    return bce_mean + dice_loss


def _dice_bce_ref(inputs, targets, smooth=1.0):
    p = jax.nn.sigmoid(inputs.astype(jnp.float32)).reshape(-1)
    t = targets.astype(jnp.float32).reshape(-1)
    inter = jnp.sum(p * t)
    dice = 1.0 - (2.0 * inter + smooth) / (jnp.sum(p) + jnp.sum(t) + smooth)
    bce = jnp.mean(-(t * jnp.maximum(jnp.log(p), -100.0)
                     + (1.0 - t) * jnp.maximum(jnp.log(1.0 - p), -100.0)))
    return bce + dice


if __name__ == "__main__":
    key = jax.random.PRNGKey(0)
    k1, k2 = jax.random.split(key)
    # NCHW logits and binary targets (segmentation-style)
    inputs = jax.random.normal(k1, (2, 4, 16, 16), dtype=jnp.float32)
    targets = jax.random.bernoulli(k2, 0.5, (2, 4, 16, 16)).astype(jnp.float32)

    loss = dice_bce_loss(inputs, targets, smooth=1.0)
    loss = jax.block_until_ready(loss)

    ref = _dice_bce_ref(inputs, targets, smooth=1.0)
    assert jnp.allclose(loss, ref, rtol=1e-5, atol=1e-5), (loss, ref)

    print("KERNEL_OK")
</pallas_src>

<mosaic_0001>
module attributes {stable_mosaic.version = 11 : i64} {
  func.func @_dice_bce_kernel(%arg0: i32, %arg1: i32, %arg2: memref<16x128xf32, #tpu.memory_space<vmem>>, %arg3: memref<16x128xf32, #tpu.memory_space<vmem>>, %arg4: memref<1x8x128xf32, #tpu.memory_space<vmem>>) attributes {dimension_semantics = [#tpu.dimension_semantics<parallel>, #tpu.dimension_semantics<arbitrary>], iteration_bounds = array<i64: 1, 1>, scalar_prefetch = 0 : i64, scratch_operands = 0 : i64, tpu.core_type = #tpu.core_type<tc>, window_params = [{transform_indices = @transform_0, window_bounds = array<i64: 16, 128>}, {transform_indices = @transform_1, window_bounds = array<i64: 16, 128>}, {transform_indices = @transform_2, window_bounds = array<i64: 1, 8, 128>}]} {
    %c0_i32 = arith.constant 0 : i32
    %0 = arith.cmpi eq, %arg1, %c0_i32 : i32
    %1 = arith.extui %0 : i1 to i32
    %c0_i32_0 = arith.constant 0 : i32
    %2 = arith.cmpi ne, %1, %c0_i32_0 : i32
    scf.if %2 {
      %cst_33 = arith.constant 0.000000e+00 : f32
      %56 = vector.broadcast %cst_33 : f32 to vector<8x128xf32>
      %c0_34 = arith.constant 0 : index
      %c0_35 = arith.constant 0 : index
      %c0_36 = arith.constant 0 : index
      %57 = vector.load %arg4[%c0_34, %c0_35, %c0_36] : memref<1x8x128xf32, #tpu.memory_space<vmem>>, vector<1x8x128xf32>
      %58 = vector.shape_cast %57 : vector<1x8x128xf32> to vector<8x128xf32>
      %59 = vector.shape_cast %56 : vector<8x128xf32> to vector<1x8x128xf32>
      tpu.vector_store %arg4[%c0_34, %c0_35, %c0_36], %59 {strides = array<i32>} : memref<1x8x128xf32, #tpu.memory_space<vmem>>, vector<1x8x128xf32>,
    } else {
    }
    %c0 = arith.constant 0 : index
    %c0_1 = arith.constant 0 : index
    %3 = vector.load %arg2[%c0, %c0_1] : memref<16x128xf32, #tpu.memory_space<vmem>>, vector<16x128xf32>
    %c0_2 = arith.constant 0 : index
    %c0_3 = arith.constant 0 : index
    %4 = vector.load %arg3[%c0_2, %c0_3] : memref<16x128xf32, #tpu.memory_space<vmem>>, vector<16x128xf32>
    %5 = math.absf %3 : vector<16x128xf32>
    %cst = arith.constant 0.000000e+00 : f32
    %6 = vector.broadcast %cst : f32 to vector<16x128xf32>
    %7 = arith.subf %6, %5 : vector<16x128xf32>
    %8 = math.exp %7 : vector<16x128xf32>
    %cst_4 = arith.constant 1.000000e+00 : f32
    %9 = vector.broadcast %cst_4 : f32 to vector<16x128xf32>
    %10 = arith.addf %9, %8 : vector<16x128xf32>
    %11 = tpu.reciprocal %10 : vector<16x128xf32> -> vector<16x128xf32>
    %cst_5 = arith.constant 0.000000e+00 : f32
    %12 = vector.broadcast %cst_5 : f32 to vector<16x128xf32>
    %13 = arith.cmpf oge, %3, %12 : vector<16x128xf32>
    %cst_6 = arith.constant 1.000000e+00 : f32
    %14 = vector.broadcast %cst_6 : f32 to vector<16x128xf32>
    %15 = arith.select %13, %14, %8 : vector<16x128xi1>, vector<16x128xf32>
    %16 = arith.mulf %15, %11 : vector<16x128xf32>
    %cst_7 = arith.constant 0.000000e+00 : f32
    %17 = vector.broadcast %cst_7 : f32 to vector<16x128xf32>
    %18 = arith.maximumf %3, %17 : vector<16x128xf32>
    %19 = arith.mulf %3, %4 : vector<16x128xf32>
    %20 = arith.subf %18, %19 : vector<16x128xf32>
    %21 = math.log1p %8 : vector<16x128xf32>
    %22 = arith.addf %20, %21 : vector<16x128xf32>
    %c0_8 = arith.constant 0 : index
    %c0_9 = arith.constant 0 : index
    %c0_10 = arith.constant 0 : index
    %23 = vector.load %arg4[%c0_8, %c0_9, %c0_10] : memref<1x8x128xf32, #tpu.memory_space<vmem>>, vector<1x1x128xf32>
    %24 = vector.shape_cast %23 : vector<1x1x128xf32> to vector<1x128xf32>
    %25 = arith.mulf %16, %4 : vector<16x128xf32>
    %cst_11 = arith.constant dense<0.000000e+00> : vector<128xf32>
    %26 = vector.multi_reduction <add>, %25, %cst_11 [0] : vector<16x128xf32> to vector<128xf32>
    %27 = vector.shape_cast %26 : vector<128xf32> to vector<1x128xf32>
    %28 = arith.addf %24, %27 : vector<1x128xf32>
    %c0_12 = arith.constant 0 : index
    %c0_13 = arith.constant 0 : index
    %c0_14 = arith.constant 0 : index
    %29 = vector.load %arg4[%c0_12, %c0_13, %c0_14] : memref<1x8x128xf32, #tpu.memory_space<vmem>>, vector<1x1x128xf32>
    %30 = vector.shape_cast %29 : vector<1x1x128xf32> to vector<1x128xf32>
    %31 = vector.shape_cast %28 : vector<1x128xf32> to vector<1x1x128xf32>
    tpu.vector_store %arg4[%c0_12, %c0_13, %c0_14], %31 {strides = array<i32>} : memref<1x8x128xf32, #tpu.memory_space<vmem>>, vector<1x1x128xf32>,
    %c0_15 = arith.constant 0 : index
    %c1 = arith.constant 1 : index
    %c0_16 = arith.constant 0 : index
    %32 = vector.load %arg4[%c0_15, %c1, %c0_16] : memref<1x8x128xf32, #tpu.memory_space<vmem>>, vector<1x1x128xf32>
    %33 = vector.shape_cast %32 : vector<1x1x128xf32> to vector<1x128xf32>
    %cst_17 = arith.constant dense<0.000000e+00> : vector<128xf32>
    %34 = vector.multi_reduction <add>, %16, %cst_17 [0] : vector<16x128xf32> to vector<128xf32>
    %35 = vector.shape_cast %34 : vector<128xf32> to vector<1x128xf32>
    %36 = arith.addf %33, %35 : vector<1x128xf32>
    %c0_18 = arith.constant 0 : index
    %c1_19 = arith.constant 1 : index
    %c0_20 = arith.constant 0 : index
    %37 = vector.load %arg4[%c0_18, %c1_19, %c0_20] : memref<1x8x128xf32, #tpu.memory_space<vmem>>, vector<1x1x128xf32>
    %38 = vector.shape_cast %37 : vector<1x1x128xf32> to vector<1x128xf32>
    %39 = vector.shape_cast %36 : vector<1x128xf32> to vector<1x1x128xf32>
    tpu.vector_store %arg4[%c0_18, %c1_19, %c0_20], %39 {strides = array<i32>} : memref<1x8x128xf32, #tpu.memory_space<vmem>>, vector<1x1x128xf32>,
    %c0_21 = arith.constant 0 : index
    %c2 = arith.constant 2 : index
    %c0_22 = arith.constant 0 : index
    %40 = vector.load %arg4[%c0_21, %c2, %c0_22] : memref<1x8x128xf32, #tpu.memory_space<vmem>>, vector<1x1x128xf32>
    %41 = vector.shape_cast %40 : vector<1x1x128xf32> to vector<1x128xf32>
    %cst_23 = arith.constant dense<0.000000e+00> : vector<128xf32>
    %42 = vector.multi_reduction <add>, %4, %cst_23 [0] : vector<16x128xf32> to vector<128xf32>
    %43 = vector.shape_cast %42 : vector<128xf32> to vector<1x128xf32>
    %44 = arith.addf %41, %43 : vector<1x128xf32>
    %c0_24 = arith.constant 0 : index
    %c2_25 = arith.constant 2 : index
    %c0_26 = arith.constant 0 : index
    %45 = vector.load %arg4[%c0_24, %c2_25, %c0_26] : memref<1x8x128xf32, #tpu.memory_space<vmem>>, vector<1x1x128xf32>
    %46 = vector.shape_cast %45 : vector<1x1x128xf32> to vector<1x128xf32>
    %47 = vector.shape_cast %44 : vector<1x128xf32> to vector<1x1x128xf32>
    tpu.vector_store %arg4[%c0_24, %c2_25, %c0_26], %47 {strides = array<i32>} : memref<1x8x128xf32, #tpu.memory_space<vmem>>, vector<1x1x128xf32>,
    %c0_27 = arith.constant 0 : index
    %c3 = arith.constant 3 : index
    %c0_28 = arith.constant 0 : index
    %48 = vector.load %arg4[%c0_27, %c3, %c0_28] : memref<1x8x128xf32, #tpu.memory_space<vmem>>, vector<1x1x128xf32>
    %49 = vector.shape_cast %48 : vector<1x1x128xf32> to vector<1x128xf32>
    %cst_29 = arith.constant dense<0.000000e+00> : vector<128xf32>
    %50 = vector.multi_reduction <add>, %22, %cst_29 [0] : vector<16x128xf32> to vector<128xf32>
    %51 = vector.shape_cast %50 : vector<128xf32> to vector<1x128xf32>
    %52 = arith.addf %49, %51 : vector<1x128xf32>
    %c0_30 = arith.constant 0 : index
    %c3_31 = arith.constant 3 : index
    %c0_32 = arith.constant 0 : index
    %53 = vector.load %arg4[%c0_30, %c3_31, %c0_32] : memref<1x8x128xf32, #tpu.memory_space<vmem>>, vector<1x1x128xf32>
    %54 = vector.shape_cast %53 : vector<1x1x128xf32> to vector<1x128xf32>
    %55 = vector.shape_cast %52 : vector<1x128xf32> to vector<1x1x128xf32>
    tpu.vector_store %arg4[%c0_30, %c3_31, %c0_32], %55 {strides = array<i32>} : memref<1x8x128xf32, #tpu.memory_space<vmem>>, vector<1x1x128xf32>,
    return
  }
  func.func @transform_0(%arg0: i32, %arg1: i32) -> (i32, i32) {
    %c1_i32 = arith.constant 1 : i32
    %0 = arith.muli %arg0, %c1_i32 : i32
    %1 = arith.addi %0, %arg1 : i32
    %c0_i32 = arith.constant 0 : i32
    %2 = arith.minsi %1, %c0_i32 : i32
    %c0_i32_0 = arith.constant 0 : i32
    %c0_i32_1 = arith.constant 0 : i32
    return %2, %c0_i32_0 : i32, i32
  }
  func.func @transform_1(%arg0: i32, %arg1: i32) -> (i32, i32) {
    %c1_i32 = arith.constant 1 : i32
    %0 = arith.muli %arg0, %c1_i32 : i32
    %1 = arith.addi %0, %arg1 : i32
    %c0_i32 = arith.constant 0 : i32
    %2 = arith.minsi %1, %c0_i32 : i32
    %c0_i32_0 = arith.constant 0 : i32
    %c0_i32_1 = arith.constant 0 : i32
    return %2, %c0_i32_0 : i32, i32
  }
  func.func @transform_2(%arg0: i32, %arg1: i32) -> (i32, i32, i32) {
    %c0_i32 = arith.constant 0 : i32
    %c0_i32_0 = arith.constant 0 : i32
    %c0_i32_1 = arith.constant 0 : i32
    return %arg0, %c0_i32, %c0_i32_0 : i32, i32, i32
  }
}

</mosaic_0001>

<bundles_post_ra>
// kernel: tpu_custom_call.1
= control target key start
LH: loop header
LB: loop body
LE: loop exit
PB: predicated region body
PF: predicated region fallthrough
CT: control target
= control target key end

     0   :  { %7 = vsyncpa [#allocation3], 0  ;;  %s391_s0 = inlined_call_operand.hbm [shape: f32[16,128], index: 0, kind: input, shape index: {}]   ;;  %s392_s1 = inlined_call_operand.hbm [shape: f32[16,128], index: 1, kind: input, shape index: {}]   ;;  %s393_s2 = inlined_call_operand.hbm [shape: f32[1,8,128], index: 2, kind: output, shape index: {}]  }
   0x1   :  { %8 = vsyncpa [#allocation6], 0 }
   0x2   :  { %9 = vsyncpa [#allocation4], 0  ;;  %s20_s11 = sshll.u32 %s391_s0, 4  ;;  %s303_s12 = smov [#allocation2]   ;;  %s21_s11 = int_to_ptr.hbm [resolvable:$true] %s20_s11 }
   0x3   :  { %s22_s13 = sshll.u32 %s303_s12, 4  ;;  %s39_s16 = sshll.u32 %s392_s1, 4  ;;  %s23_s13 = int_to_ptr.vmem [resolvable:$true] %s22_s13  ;;  %s40_s16 = int_to_ptr.hbm [resolvable:$true] %s39_s16 }
   0x4   :  { %s304_s17 = smov 128   ;;  %s305_s18 = smov 8  }
   0x5   :  { %28 = dma.hbm_to_vmem [thread:$0]  %s21_s11, 256, %s23_s13, [#allocation3], %s304_s17, %s304_s17, %s305_s18  }
   0x6   :  { %s306_s19 = smov [#allocation5]  }
   0x7   :  { %s41_s20 = sshll.u32 %s306_s19, 4  ;;  %s42_s20 = int_to_ptr.vmem [resolvable:$true] %s41_s20 }
   0x8   :  { %47 = dma.hbm_to_vmem [thread:$0]  %s40_s16, 256, %s42_s20, [#allocation6], %s304_s17, %s304_s17, %s305_s18  }
   0x9   :  { %297 = dma.done.wait [#allocation3], 256  }
   0xa   :  { %298 = vsyncadd [#allocation3], 4294967040 }
   0xb   :  { %299 = dma.done.wait [#allocation6], 256  }
   0xc   :  { %300 = vsyncadd [#allocation6], 4294967040  ;;  %v307_v0 = vmov 0.0   ;;  %v330_v1 = vld [vmem:[#allocation2] sm:$0xff]  ;;  %v332_v2 = vld [vmem:[#allocation2 + $0x8] sm:$0xff]  ;;  %s308_s0 = smov [#allocation7]  }
   0xd   :  { %68 = vst [vmem:[#allocation7] sm:$0xff] %v307_v0  ;;  %v73_v3 = vand.u32 2147483647, %v330_v1  ;;  %v74_v4 = vand.u32 2147483647, %v332_v2  ;;  %v336_v7 = vld [vmem:[#allocation5] sm:$0xff] }
   0xe   :  { %v338_v8 = vld [vmem:[#allocation5 + $0x8] sm:$0xff]  ;;  %v117_v22 = vmax.f32 %v330_v1, 0.0  ;;  %v119_v23 = vmul.f32 %v336_v7, %v330_v1  ;;  %v118_v25 = vmax.f32 %v332_v2, 0.0  ;;  %vm111_vm6 = vcmp.ge.f32.partialorder %v330_v1, 0.0  ;;  %s190_s1 = sshll.u32 %s308_s0, 4  ;;  %s192_s23 = sshll.u32 %s393_s2, 4  ;;  %s191_s1 = int_to_ptr.vmem [resolvable:$true] %s190_s1  ;;  %s193_s23 = int_to_ptr.hbm [resolvable:$true] %s192_s23 }
   0xf   :  { %v75_v5 = vsub.f32 0.0, %v73_v3  ;;  %v76_v6 = vsub.f32 0.0, %v74_v4  ;;  %v166_v11 = vadd.f32 %v338_v8, %v336_v7  ;;  %v120_v26 = vmul.f32 %v338_v8, %v332_v2 }
  0x10   :  { %v121_v32 = vsub.f32 %v117_v22, %v119_v23  ;;  %vm112_vm7 = vcmp.ge.f32.partialorder %v332_v2, 0.0 }
  0x11   :  { %v77_v9 = vmul.f32 1.442695, %v75_v5  ;;  %v79_v10 = vmul.f32 1.442695, %v76_v6  ;;  %v167_v12 = vrot.slane %v166_v11, 4  ;;  %v122_v37 = vsub.f32 %v118_v25, %v120_v26 }
  0x13   :  { %213 = vpow2.f32 %v77_v9  ;;  %v168_v13 = vadd.f32 %v167_v12, %v166_v11 }
  0x14   :  { %215 = vpow2.f32 %v79_v10  ;;  %v165_v27 = vld [vmem:[#allocation7 + $0x2] sm:$0x1]  ;;  %v175_v26 = vld [vmem:[#allocation7 + $0x3] sm:$0x1] }
  0x15   :  { %v169_v14 = vrot.slane %v168_v13, 2 }
  0x17   :  { %v170_v18 = vadd.f32 %v169_v14, %v168_v13 }
  0x19   :  { %v342_v15 = vpop.eup %213  ;;  %v171_v24 = vrot.slane %v170_v18, 1 }
  0x1a   :  { %v344_v16 = vpop.eup %215  ;;  %v81_v17 = vadd.f32 1.0, %v342_v15  ;;  %v126_v20 = vmul.f32 -0.5, %v342_v15  ;;  %v129_v30 = vand.u32 2147483647, %v342_v15  ;;  %v113_v1 = vsel %vm111_vm6, 1.0, %v342_v15 }
  0x1b   :  { %v82_v19 = vadd.f32 1.0, %v344_v16  ;;  %v135_v21 = vmul.f32 -0.5, %v344_v16  ;;  %v172_v28 = vadd.f32 %v171_v24, %v170_v18  ;;  %v138_v33 = vand.u32 2147483647, %v344_v16 }
  0x1c   :  { %217 = vrcp.f32 %v81_v17  ;;  %v127_v29 = vadd.f32 1.0, %v126_v20  ;;  %vm88_vm0 = vweird.f32 %v81_v17  ;;  %v92_v35 = vand.u32 2147483647, %v81_v17 }
  0x1d   :  { %219 = vrcp.f32 %v82_v19  ;;  %v136_v31 = vadd.f32 1.0, %v135_v21  ;;  %v173_v36 = vadd.f32 %v172_v28, %v165_v27  ;;  %v94_v40 = vand.u32 2147483648, %v81_v17 }
  0x1e   :  { %221 = vlog2.f32 %v81_v17  ;;  %vm102_vm1 = vweird.f32 %v82_v19  ;;  %v128_v41 = vmul.f32 %v342_v15, %v127_v29  ;;  %v108_v44 = vand.u32 2147483648, %v82_v19 }
  0x1f   :  { %223 = vlog2.f32 %v82_v19  ;;  %174 = vst [vmem:[#allocation7 + $0x2] sm:$0x1] %v173_v36  ;;  %vm359_vm2 = vcmp.lt.f32.partialorder %v129_v30, 0.0004427343  ;;  %v137_v46 = vmul.f32 %v344_v16, %v136_v31  ;;  %vm364_vm4 = vcmp.lt.f32.partialorder %v138_v33, 0.0004427343 }
  0x20   :  { %v106_v52 = vand.u32 2147483647, %v82_v19  ;;  %v95_v57 = vor.u32 1.1754944e-38, %v94_v40  ;;  %vm93_vm9 = vcmp.eq.f32.partialorder %v92_v35, 8.507059e+37  ;;  %v109_v62 = vor.u32 1.1754944e-38, %v108_v44 }
  0x21   :  { %v114_v4 = vsel %vm112_vm7, 1.0, %v344_v16 }
  0x22   :  { %v218_v34 = vpop.eup %217  ;;  %vm107_vm11 = vcmp.eq.f32.partialorder %v106_v52, 8.507059e+37 }
  0x23   :  { %v220_v38 = vpop.eup %219  ;;  %v84_v39 = vmul.f32 %v218_v34, %v81_v17  ;;  %vm89_vm3 = vweird.f32 %v218_v34 }
  0x24   :  { %v222_v42 = vpop.eup %221  ;;  %v98_v43 = vmul.f32 %v220_v38, %v82_v19  ;;  %vm103_vm5 = vweird.f32 %v220_v38  ;;  %vm373_vm8 = vmor %vm88_vm0, %vm89_vm3 }
  0x25   :  { %v224_v47 = vpop.eup %223  ;;  %v85_v48 = vsub.f32 1.0, %v84_v39  ;;  %v125_v49 = vmul.f32 0.6931472, %v222_v42  ;;  %vm104_vm10 = vmor %vm102_vm1, %vm103_vm5 }
  0x26   :  { %v99_v51 = vsub.f32 1.0, %v98_v43  ;;  %v134_v53 = vmul.f32 0.6931472, %v224_v47 }
  0x27   :  { %v86_v54 = vmul.f32 %v218_v34, %v85_v48  ;;  %v131_v55 = vsel %vm359_vm2, %v128_v41, %v125_v49 }
  0x28   :  { %v100_v58 = vmul.f32 %v220_v38, %v99_v51  ;;  %v140_v59 = vsel %vm364_vm4, %v137_v46, %v134_v53  ;;  %v141_v60 = vadd.f32 %v131_v55, %v121_v32  ;;  %v155_v32 = vld [vmem:[#allocation7 + $0x1] sm:$0x1] }
  0x29   :  { %v87_v61 = vadd.f32 %v218_v34, %v86_v54  ;;  %v142_v63 = vadd.f32 %v140_v59, %v122_v37 }
  0x2a   :  { %v101_v0 = vadd.f32 %v220_v38, %v100_v58 }
  0x2b   :  { %v91_v3 = vsel %vm373_vm8, %v218_v34, %v87_v61  ;;  %v176_v5 = vadd.f32 %v142_v63, %v141_v60  ;;  %v143_v34 = vld [vmem:[#allocation7] sm:$0x1] }
  0x2c   :  { %v96_v6 = vsel %vm93_vm9, %v95_v57, %v91_v3  ;;  %v105_v9 = vsel %vm104_vm10, %v220_v38, %v101_v0 }
  0x2d   :  { %v110_v10 = vsel %vm107_vm11, %v109_v62, %v105_v9  ;;  %v115_v11 = vmul.f32 %v113_v1, %v96_v6  ;;  %v177_v12 = vrot.slane %v176_v5, 4 }
  0x2e   :  { %v116_v13 = vmul.f32 %v114_v4, %v110_v10 }
  0x2f   :  { %v144_v14 = vmul.f32 %v115_v11, %v336_v7  ;;  %v178_v17 = vadd.f32 %v177_v12, %v176_v5 }
  0x30   :  { %v145_v18 = vmul.f32 %v116_v13, %v338_v8  ;;  %v156_v15 = vadd.f32 %v116_v13, %v115_v11 }
  0x31   :  { %v179_v19 = vrot.slane %v178_v17, 2 }
  0x32   :  { %v146_v20 = vadd.f32 %v145_v18, %v144_v14  ;;  %v157_v21 = vrot.slane %v156_v15, 4 }
  0x33   :  { %v180_v22 = vadd.f32 %v179_v19, %v178_v17 }
  0x34   :  { %v147_v23 = vrot.slane %v146_v20, 4  ;;  %v158_v2 = vadd.f32 %v157_v21, %v156_v15 }
  0x35   :  { %v181_v16 = vrot.slane %v180_v22, 1 }
  0x36   :  { %v148_v24 = vadd.f32 %v147_v23, %v146_v20  ;;  %v159_v25 = vrot.slane %v158_v2, 2 }
  0x37   :  { %v182_v27 = vadd.f32 %v181_v16, %v180_v22 }
  0x38   :  { %v149_v28 = vrot.slane %v148_v24, 2  ;;  %v160_v29 = vadd.f32 %v159_v25, %v158_v2 }
  0x39   :  { %v183_v30 = vadd.f32 %v182_v27, %v175_v26 }
  0x3a   :  { %v150_v31 = vadd.f32 %v149_v28, %v148_v24  ;;  %v161_v7 = vrot.slane %v160_v29, 1 }
  0x3b   :  { %184 = vst [vmem:[#allocation7 + $0x3] sm:$0x1] %v183_v30 }
  0x3c   :  { %v151_v8 = vrot.slane %v150_v31, 1  ;;  %v162_v33 = vadd.f32 %v161_v7, %v160_v29 }
  0x3e   :  { %v152_v35 = vadd.f32 %v151_v8, %v150_v31  ;;  %v163_v36 = vadd.f32 %v162_v33, %v155_v32 }
  0x40   :  { %v153_v37 = vadd.f32 %v152_v35, %v143_v34  ;;  %164 = vst [vmem:[#allocation7 + $0x1] sm:$0x1] %v163_v36 }
  0x42   :  { %154 = vst [vmem:[#allocation7] sm:$0x1] %v153_v37 }
  0x43   :  { %195 = dma.vmem_to_hbm [thread:$0]  %s191_s1, 128, %s193_s23, [#allocation4]  }
  0x44   :  { %301 = dma.done.wait [#allocation4], 128  }
  0x45   :  { %302 = vsyncadd [#allocation4], 4294967168 }
  0x46   :  { %200 = vsyncpa [#allocation3], 1 }
  0x47   :  { %201 = vsyncpa [#allocation6], 1 }
  0x48   :  { %202 = vsyncpa [#allocation4], 1 }

</bundles_post_ra>
